<compile_context>
chip_gen: v5e
topology: v5e:2x2
jax: 0.10.0
libtpu: 0.0.40
codegen_flags: <defaults>
</compile_context>

<pallas_src>
import functools

import jax
import jax.numpy as jnp
from jax import lax
from jax.experimental import pallas as pl
from jax.experimental.pallas import tpu as pltpu


LANES = 128
ACC_ROWS = 8                      # vreg-shaped (8, 128) accumulator
CHUNK_ROWS = 128                  # rows per fused accumulate chunk (64 KiB f32)
MAX_TILE_ROWS = 8192              # cap on rows per block (bounds unroll count)
MAX_BLOCK_BYTES = 4 * 1024 * 1024 # per-input HBM block (4 MiB)
NCORES = 2                        # leading "parallel" axis (TensorCore split)
VMEM_LIMIT_BYTES = 32 * 1024 * 1024


def _round_up(x, m):
    return ((x + m - 1) // m) * m


def _l1_sum_kernel(a_ref, b_ref, o_ref, acc_ref, *, tile_rows, chunk_rows,
                   nblocks, partial_rows, has_oob_blocks):
    """Accumulate sum(|a-b|) of this core's blocks into an (8,128) partial."""
    n_chunks = tile_rows // chunk_rows

    c = pl.program_id(0)
    k = pl.program_id(1)
    num_k = pl.num_programs(1)
    bi = c * num_k + k                       # logical (unclamped) block index

    @pl.when(k == 0)
    def _init():
        acc_ref[...] = jnp.zeros_like(acc_ref)

    def chunk_sum(i, valid_rows=None):
        start = i * chunk_rows
        if not isinstance(start, int):
            start = pl.multiple_of(start, chunk_rows)
        a = a_ref[pl.ds(start, chunk_rows), :].astype(jnp.float32)
        b = b_ref[pl.ds(start, chunk_rows), :].astype(jnp.float32)
        d = jnp.abs(a - b)
        if valid_rows is not None:
            # Only the single ragged chunk of the single last block pays this.
            rid = lax.broadcasted_iota(jnp.int32, (chunk_rows, LANES), 0)
            d = jnp.where(rid < valid_rows, d, 0.0)
        # Fold rows onto the (8, 128) vreg shape (pure VPU adds).
        return jnp.sum(
            d.reshape(chunk_rows // ACC_ROWS, ACC_ROWS, LANES), axis=0)

    def accumulate_full(n):
        """acc_ref += sum over `n` full chunks (n is a Python int)."""
        if n <= 0:
            return
        if n == 1:
            acc_ref[...] += chunk_sum(0)
        else:
            acc = lax.fori_loop(
                0, n, lambda i, s: s + chunk_sum(i), acc_ref[...],
                unroll=True)
            acc_ref[...] = acc

    if partial_rows == 0:
        if has_oob_blocks:
            # Skip the (at most one per core) clamped duplicate block.
            @pl.when(bi < nblocks)
            def _steady():
                accumulate_full(n_chunks)
        else:
            accumulate_full(n_chunks)        # pure streaming steady state
    else:
        @pl.when(bi < nblocks - 1)           # interior blocks: no masking
        def _steady():
            accumulate_full(n_chunks)

        @pl.when(bi == nblocks - 1)          # single ragged last block
        def _tail():
            full = partial_rows // chunk_rows
            ragged = partial_rows % chunk_rows
            accumulate_full(full)
            if ragged:
                acc_ref[...] += chunk_sum(full, valid_rows=ragged)

    @pl.when(k == num_k - 1)
    def _emit():
        o_ref[...] = acc_ref[...]


def l1_loss(p_target, p_estimate):
    """nn.L1Loss(reduction='mean')(p_target, p_estimate)."""
    assert p_target.shape == p_estimate.shape
    n_elems = p_target.size
    if n_elems == 0:
        return jnp.array(jnp.nan, dtype=p_target.dtype)

    a = jnp.ravel(p_target)
    b = jnp.ravel(p_estimate)

    # Minimal zero-pad so the flat length is a multiple of 8*128 (keeps rows
    # sublane-aligned); |0 - 0| = 0 so padding never affects the sum.
    quantum = ACC_ROWS * LANES
    padded = _round_up(n_elems, quantum)
    pad = padded - n_elems
    if pad:
        a = jnp.pad(a, (0, pad))
        b = jnp.pad(b, (0, pad))

    rows = padded // LANES                       # multiple of ACC_ROWS
    chunk_rows = min(CHUNK_ROWS, rows)           # multiple of ACC_ROWS

    itemsize = jnp.dtype(p_target.dtype).itemsize
    max_tile_rows = min(MAX_TILE_ROWS, MAX_BLOCK_BYTES // (LANES * itemsize))
    max_tile_rows = max(chunk_rows,
                        (max_tile_rows // chunk_rows) * chunk_rows)
    tile_rows = min(max_tile_rows, (rows // chunk_rows) * chunk_rows)
    tile_rows = max(tile_rows, chunk_rows)       # multiple of chunk_rows <= rows

    nblocks = pl.cdiv(rows, tile_rows)
    partial_rows = rows % tile_rows              # rows in the ragged last block
    ncores = min(NCORES, nblocks)
    num_k = pl.cdiv(nblocks, ncores)
    has_oob_blocks = ncores * num_k != nblocks

    a2 = a.reshape(rows, LANES)
    b2 = b.reshape(rows, LANES)

    def in_map(c, k):
        # Clamp the (at most one per core) out-of-range logical block onto
        # the last real block; its compute is skipped in-kernel.
        return (jnp.minimum(c * num_k + k, nblocks - 1), 0)

    kernel = functools.partial(
        _l1_sum_kernel,
        tile_rows=tile_rows,
        chunk_rows=chunk_rows,
        nblocks=nblocks,
        partial_rows=partial_rows,
        has_oob_blocks=has_oob_blocks,
    )

    partials = pl.pallas_call(
        kernel,
        out_shape=jax.ShapeDtypeStruct((ncores * ACC_ROWS, LANES), jnp.float32),
        grid_spec=pltpu.PrefetchScalarGridSpec(
            num_scalar_prefetch=0,
            grid=(ncores, num_k),
            in_specs=[
                pl.BlockSpec((tile_rows, LANES), in_map),
                pl.BlockSpec((tile_rows, LANES), in_map),
            ],
            out_specs=pl.BlockSpec((ACC_ROWS, LANES), lambda c, k: (c, 0)),
            scratch_shapes=[pltpu.VMEM((ACC_ROWS, LANES), jnp.float32)],
        ),
        compiler_params=pltpu.CompilerParams(
            dimension_semantics=("parallel", "arbitrary"),
            vmem_limit_bytes=VMEM_LIMIT_BYTES,
        ),
        cost_estimate=pl.CostEstimate(
            flops=3 * padded,
            transcendentals=0,
            bytes_accessed=2 * padded * itemsize
            + ncores * ACC_ROWS * LANES * 4,
        ),
    )(a2, b2)

    total = jnp.sum(partials)
    # reduction='mean' in nn.L1Loss -> divide by ORIGINAL element count.
    return (total / n_elems).astype(p_target.dtype)


if __name__ == "__main__":
    key = jax.random.PRNGKey(0)
    k1, k2, k3, k4, k5, k6, k7, k8 = jax.random.split(key, 8)

    # Small NCHW-shaped example consistent with the module's usage.
    p_target = jax.random.uniform(k1, (2, 4, 16, 16), dtype=jnp.float32)
    p_estimate = jax.random.uniform(k2, (2, 4, 16, 16), dtype=jnp.float32)
    loss = l1_loss(p_target, p_estimate)
    jax.block_until_ready(loss)
    ref = jnp.mean(jnp.abs(p_target - p_estimate))
    assert jnp.allclose(loss, ref, rtol=1e-5, atol=1e-6), (loss, ref)

    # Odd-sized tiny input: exercises the minimal zero-pad path.
    t2 = jax.random.uniform(k3, (3, 5, 7), dtype=jnp.float32)
    e2 = jax.random.uniform(k4, (3, 5, 7), dtype=jnp.float32)
    loss2 = l1_loss(t2, e2)
    jax.block_until_ready(loss2)
    ref2 = jnp.mean(jnp.abs(t2 - e2))
    assert jnp.allclose(loss2, ref2, rtol=1e-5, atol=1e-6), (loss2, ref2)

    # Ragged last-chunk path (rows not a multiple of the chunk size).
    t3 = jax.random.uniform(k5, (4, 40, 160), dtype=jnp.float32)
    e3 = jax.random.uniform(k6, (4, 40, 160), dtype=jnp.float32)
    loss3 = l1_loss(t3, e3)
    jax.block_until_ready(loss3)
    ref3 = jnp.mean(jnp.abs(t3 - e3))
    assert jnp.allclose(loss3, ref3, rtol=1e-5, atol=1e-6), (loss3, ref3)

    # Multi-block / two-core path with a partial (chunk-aligned) last block.
    t4 = jax.random.uniform(k7, (1, 4, 320, 512), dtype=jnp.float32)
    e4 = jax.random.uniform(k8, (1, 4, 320, 512), dtype=jnp.float32)
    loss4 = l1_loss(t4, e4)
    jax.block_until_ready(loss4)
    ref4 = jnp.mean(jnp.abs(t4 - e4))
    assert jnp.allclose(loss4, ref4, rtol=1e-5, atol=1e-6), (loss4, ref4)

    print("KERNEL_OK")
</pallas_src>

<mosaic_0001>
module attributes {stable_mosaic.version = 11 : i64} {
  func.func @_l1_sum_kernel(%arg0: i32, %arg1: i32, %arg2: memref<16x128xf32, #tpu.memory_space<vmem>>, %arg3: memref<16x128xf32, #tpu.memory_space<vmem>>, %arg4: memref<8x128xf32, #tpu.memory_space<vmem>>, %arg5: memref<8x128xf32, #tpu.memory_space<vmem>>) attributes {dimension_semantics = [#tpu.dimension_semantics<parallel>, #tpu.dimension_semantics<arbitrary>], iteration_bounds = array<i64: 1, 1>, scalar_prefetch = 0 : i64, scratch_operands = 1 : i64, tpu.core_type = #tpu.core_type<tc>, window_params = [{transform_indices = @transform_0, window_bounds = array<i64: 16, 128>}, {transform_indices = @transform_1, window_bounds = array<i64: 16, 128>}, {transform_indices = @transform_2, window_bounds = array<i64: 8, 128>}]} {
    %c0_i32 = arith.constant 0 : i32
    %0 = arith.cmpi eq, %arg1, %c0_i32 : i32
    %1 = arith.extui %0 : i1 to i32
    %c0_i32_0 = arith.constant 0 : i32
    %2 = arith.cmpi ne, %1, %c0_i32_0 : i32
    scf.if %2 {
      %cst_10 = arith.constant 0.000000e+00 : f32
      %15 = vector.broadcast %cst_10 : f32 to vector<8x128xf32>
      %c0_11 = arith.constant 0 : index
      %c0_12 = arith.constant 0 : index
      %16 = vector.load %arg5[%c0_11, %c0_12] : memref<8x128xf32, #tpu.memory_space<vmem>>, vector<8x128xf32>
      tpu.vector_store %arg5[%c0_11, %c0_12], %15 {strides = array<i32>} : memref<8x128xf32, #tpu.memory_space<vmem>>, vector<8x128xf32>,
    } else {
    }
    %c0 = arith.constant 0 : index
    %c0_1 = arith.constant 0 : index
    %3 = vector.load %arg5[%c0, %c0_1] : memref<8x128xf32, #tpu.memory_space<vmem>>, vector<8x128xf32>
    %c0_2 = arith.constant 0 : index
    %c0_3 = arith.constant 0 : index
    %4 = vector.load %arg2[%c0_2, %c0_3] : memref<16x128xf32, #tpu.memory_space<vmem>>, vector<16x128xf32>
    %c0_4 = arith.constant 0 : index
    %c0_5 = arith.constant 0 : index
    %5 = vector.load %arg3[%c0_4, %c0_5] : memref<16x128xf32, #tpu.memory_space<vmem>>, vector<16x128xf32>
    %6 = arith.subf %4, %5 : vector<16x128xf32>
    %7 = math.absf %6 : vector<16x128xf32>
    %8 = vector.shape_cast %7 : vector<16x128xf32> to vector<2x8x128xf32>
    %cst = arith.constant dense<0.000000e+00> : vector<8x128xf32>
    %9 = vector.multi_reduction <add>, %8, %cst [0] : vector<2x8x128xf32> to vector<8x128xf32>
    %10 = arith.addf %3, %9 : vector<8x128xf32>
    %c0_6 = arith.constant 0 : index
    %c0_7 = arith.constant 0 : index
    %11 = vector.load %arg5[%c0_6, %c0_7] : memref<8x128xf32, #tpu.memory_space<vmem>>, vector<8x128xf32>
    tpu.vector_store %arg5[%c0_6, %c0_7], %10 {strides = array<i32>} : memref<8x128xf32, #tpu.memory_space<vmem>>, vector<8x128xf32>,
    %c0_i32_8 = arith.constant 0 : i32
    %12 = arith.cmpi eq, %arg1, %c0_i32_8 : i32
    %13 = arith.extui %12 : i1 to i32
    %c0_i32_9 = arith.constant 0 : i32
    %14 = arith.cmpi ne, %13, %c0_i32_9 : i32
    scf.if %14 {
      %c0_10 = arith.constant 0 : index
      %c0_11 = arith.constant 0 : index
      %15 = vector.load %arg5[%c0_10, %c0_11] : memref<8x128xf32, #tpu.memory_space<vmem>>, vector<8x128xf32>
      %c0_12 = arith.constant 0 : index
      %c0_13 = arith.constant 0 : index
      %16 = vector.load %arg4[%c0_12, %c0_13] : memref<8x128xf32, #tpu.memory_space<vmem>>, vector<8x128xf32>
      tpu.vector_store %arg4[%c0_12, %c0_13], %15 {strides = array<i32>} : memref<8x128xf32, #tpu.memory_space<vmem>>, vector<8x128xf32>,
    } else {
    }
    return
  }
  func.func @transform_0(%arg0: i32, %arg1: i32) -> (i32, i32) {
    %c1_i32 = arith.constant 1 : i32
    %0 = arith.muli %arg0, %c1_i32 : i32
    %1 = arith.addi %0, %arg1 : i32
    %c0_i32 = arith.constant 0 : i32
    %2 = arith.minsi %1, %c0_i32 : i32
    %c0_i32_0 = arith.constant 0 : i32
    %c0_i32_1 = arith.constant 0 : i32
    return %2, %c0_i32_0 : i32, i32
  }
  func.func @transform_1(%arg0: i32, %arg1: i32) -> (i32, i32) {
    %c1_i32 = arith.constant 1 : i32
    %0 = arith.muli %arg0, %c1_i32 : i32
    %1 = arith.addi %0, %arg1 : i32
    %c0_i32 = arith.constant 0 : i32
    %2 = arith.minsi %1, %c0_i32 : i32
    %c0_i32_0 = arith.constant 0 : i32
    %c0_i32_1 = arith.constant 0 : i32
    return %2, %c0_i32_0 : i32, i32
  }
  func.func @transform_2(%arg0: i32, %arg1: i32) -> (i32, i32) {
    %c0_i32 = arith.constant 0 : i32
    %c0_i32_0 = arith.constant 0 : i32
    return %arg0, %c0_i32 : i32, i32
  }
}

</mosaic_0001>

<bundles_post_ra>
// kernel: tpu_custom_call.1
= control target key start
LH: loop header
LB: loop body
LE: loop exit
PB: predicated region body
PF: predicated region fallthrough
CT: control target
= control target key end

     0   :  { %7 = vsyncpa [#allocation4], 0  ;;  %s220_s0 = inlined_call_operand.hbm [shape: f32[16,128], index: 0, kind: input, shape index: {}]   ;;  %s221_s1 = inlined_call_operand.hbm [shape: f32[16,128], index: 1, kind: input, shape index: {}]   ;;  %s222_s2 = inlined_call_operand.hbm [shape: f32[8,128], index: 2, kind: output, shape index: {}]  }
   0x1   :  { %8 = vsyncpa [#allocation7], 0 }
   0x2   :  { %9 = vsyncpa [#allocation5], 0  ;;  %s20_s11 = sshll.u32 %s220_s0, 4  ;;  %s191_s12 = smov [#allocation3]   ;;  %s21_s11 = int_to_ptr.hbm [resolvable:$true] %s20_s11 }
   0x3   :  { %s22_s13 = sshll.u32 %s191_s12, 4  ;;  %s39_s16 = sshll.u32 %s221_s1, 4  ;;  %s23_s13 = int_to_ptr.vmem [resolvable:$true] %s22_s13  ;;  %s40_s16 = int_to_ptr.hbm [resolvable:$true] %s39_s16 }
   0x4   :  { %s192_s17 = smov 128   ;;  %s193_s18 = smov 8  }
   0x5   :  { %28 = dma.hbm_to_vmem [thread:$0]  %s21_s11, 256, %s23_s13, [#allocation4], %s192_s17, %s192_s17, %s193_s18  }
   0x6   :  { %s194_s19 = smov [#allocation6]  }
   0x7   :  { %s41_s20 = sshll.u32 %s194_s19, 4  ;;  %s42_s20 = int_to_ptr.vmem [resolvable:$true] %s41_s20 }
   0x8   :  { %47 = dma.hbm_to_vmem [thread:$0]  %s40_s16, 256, %s42_s20, [#allocation7], %s192_s17, %s192_s17, %s193_s18  }
   0x9   :  { %185 = dma.done.wait [#allocation4], 256  }
   0xa   :  { %186 = vsyncadd [#allocation4], 4294967040 }
   0xb   :  { %187 = dma.done.wait [#allocation7], 256  }
   0xc   :  { %188 = vsyncadd [#allocation7], 4294967040  ;;  %v70_v0 = vld [vmem:[#allocation3] sm:$0xff]  ;;  %v71_v1 = vld [vmem:[#allocation3 + $0x8] sm:$0xff]  ;;  %s195_s0 = smov [#allocation8]   ;;  %s93_s23 = sshll.u32 %s222_s2, 4  ;;  %s94_s23 = int_to_ptr.hbm [resolvable:$true] %s93_s23 }
   0xd   :  { %v72_v2 = vld [vmem:[#allocation6] sm:$0xff]  ;;  %v73_v3 = vld [vmem:[#allocation6 + $0x8] sm:$0xff]  ;;  %s91_s1 = sshll.u32 %s195_s0, 4  ;;  %s92_s1 = int_to_ptr.vmem [resolvable:$true] %s91_s1 }
   0xe   :  { %v74_v4 = vsub.f32 %v70_v0, %v72_v2  ;;  %v75_v5 = vsub.f32 %v71_v1, %v73_v3 }
  0x10   :  { %v76_v6 = vand.u32 2147483647, %v74_v4  ;;  %v77_v7 = vand.u32 2147483647, %v75_v5 }
  0x12   :  { %v78_v8 = vadd.f32 %v77_v7, %v76_v6 }
  0x14   :  { %85 = vst [vmem:[#allocation8] sm:$0xff] %v78_v8 }
  0x15   :  { %96 = dma.vmem_to_hbm [thread:$0]  %s92_s1, 128, %s94_s23, [#allocation5]  }
  0x16   :  { %189 = dma.done.wait [#allocation5], 128  }
  0x17   :  { %190 = vsyncadd [#allocation5], 4294967168 }
  0x18   :  { %101 = vsyncpa [#allocation4], 1 }
  0x19   :  { %102 = vsyncpa [#allocation7], 1 }
  0x1a   :  { %103 = vsyncpa [#allocation5], 1 }

</bundles_post_ra>
